<compile_context>
chip_gen: v7x
topology: tpu7x:2x2x1
jax: 0.10.0
libtpu: 0.0.40
codegen_flags: <defaults>
</compile_context>

<pallas_src>
import jax
import jax.numpy as jnp
from jax.experimental import pallas as pl
from jax.experimental.pallas import tpu as pltpu

_INV_SQRT2 = 0.7071067811865476


def _bert_intermediate_kernel(x_ref, w_ref, b_ref, o_ref):
    # x_ref: (TM, H), w_ref: (H, TN), b_ref: (1, TN), o_ref: (TM, TN)
    h = jnp.dot(x_ref[...], w_ref[...], preferred_element_type=jnp.float32)
    h = h + b_ref[...].astype(jnp.float32)
    # HF "gelu": exact erf-based gelu: 0.5 * x * (1 + erf(x / sqrt(2)))
    o_ref[...] = (0.5 * h * (1.0 + jax.lax.erf(h * _INV_SQRT2))).astype(o_ref.dtype)


def _cdiv(a, b):
    return -(-a // b)


def _round_up(x, m):
    return _cdiv(x, m) * m


def _vmem_footprint(tm, tn, h, x_bytes, w_bytes, o_bytes, w_buffers):
    """Rough per-kernel VMEM footprint for tile choice (incl. f32 body temps)."""
    return (2 * tm * h * x_bytes              # double-buffered activation tile
            + w_buffers * h * tn * w_bytes    # resident weight slab
            + w_buffers * tn * w_bytes        # bias
            + 2 * tm * tn * o_bytes           # double-buffered output tile
            + 2 * tm * tn * 4)                # f32 matmul result + epilogue temps


def _pick_tiles(M, H, I, x_bytes, w_bytes, o_bytes, budget, w_buffers):
    # TN: prefer the whole intermediate dim (single-pass x AND w reads);
    # otherwise the largest lane-dense (multiple-of-128) tile that fits.
    tn_cands = [I] + [t for t in (4096, 2048, 1024, 512, 256, 128) if t < I]
    # TM: large sublane-dense (multiple-of-8) tiles to amortize grid overhead.
    tm_cands = [t for t in (2048, 1024, 512, 256, 128, 64, 32, 16, 8) if t <= M] or [M]

    for tn in tn_cands:
        for tm in tm_cands:
            if _vmem_footprint(tm, tn, H, x_bytes, w_bytes, o_bytes, w_buffers) <= budget:
                return tm, tn
    return tm_cands[-1], tn_cands[-1]   # tiny problems always land here or earlier


def bert_intermediate(hidden_states, weight, bias):
    """hidden_states: [B, S, H]; weight: [H, I] (torch weight transposed); bias: [I]."""
    B, S, H = hidden_states.shape
    I = weight.shape[1]
    M = B * S

    x2d = hidden_states.reshape(M, H)
    b2d = bias.reshape(1, I)

    x_bytes = jnp.dtype(hidden_states.dtype).itemsize
    w_bytes = jnp.dtype(weight.dtype).itemsize
    b_bytes = jnp.dtype(bias.dtype).itemsize
    o_bytes = x_bytes  # output in activation dtype

    # Generation-aware VMEM budget (v5e/v6e 128 MiB, v7x 64 MiB physical).
    try:
        vmem_cap = int(pltpu.get_tpu_info().vmem_capacity_bytes)
    except Exception:
        vmem_cap = 64 * 1024 * 1024  # conservative (v7x-sized) fallback
    budget = int(vmem_cap * 0.70)    # headroom for compiler temporaries / spills
    vmem_limit = int(vmem_cap * 0.90)

    def build(single_buffer_weights):
        w_buffers = 1 if single_buffer_weights else 2
        TM, TN = _pick_tiles(M, H, I, x_bytes, w_bytes, o_bytes, budget, w_buffers)

        # Megacore (v7x): keep >=2 blocks on a parallel axis for large problems
        # so both TensorCores get work.
        if _cdiv(I, TN) == 1 and _cdiv(M, TM) == 1 and M >= 256:
            TM = max(8, _round_up(_cdiv(M, 2), 8))

        n_n, n_m = _cdiv(I, TN), _cdiv(M, TM)
        grid = (n_n, n_m)  # N outer (weight resident over M), M inner (x streamed)

        cost = pl.CostEstimate(
            flops=2 * M * H * I,
            transcendentals=M * I,
            bytes_accessed=(n_n * M * H * x_bytes   # x read once per N tile
                            + H * I * w_bytes       # weight, single pass
                            + I * b_bytes           # bias
                            + M * I * o_bytes),     # output write
        )

        spec_kwargs = {}
        if single_buffer_weights:
            # Weight/bias block index only changes on the outer N axis; no need
            # to double-buffer them -> halves their VMEM footprint.
            spec_kwargs = dict(pipeline_mode=pl.Buffered(1))

        return pl.pallas_call(
            _bert_intermediate_kernel,
            out_shape=jax.ShapeDtypeStruct((M, I), hidden_states.dtype),
            grid_spec=pltpu.PrefetchScalarGridSpec(
                num_scalar_prefetch=0,
                grid=grid,
                in_specs=[
                    pl.BlockSpec((TM, H), lambda n, m: (m, 0)),                  # activations
                    pl.BlockSpec((H, TN), lambda n, m: (0, n), **spec_kwargs),   # weight
                    pl.BlockSpec((1, TN), lambda n, m: (0, n), **spec_kwargs),   # bias
                ],
                out_specs=pl.BlockSpec((TM, TN), lambda n, m: (m, n)),
            ),
            compiler_params=pltpu.CompilerParams(
                dimension_semantics=("parallel", "parallel"),
                vmem_limit_bytes=vmem_limit,
            ),
            cost_estimate=cost,
        )

    try:
        out = build(single_buffer_weights=True)(x2d, weight, b2d)
    except Exception:
        # Graceful fallback if this JAX build rejects pipeline_mode=pl.Buffered(1).
        out = build(single_buffer_weights=False)(x2d, weight, b2d)
    return out.reshape(B, S, I)


if __name__ == "__main__":
    # Small BERT-like config: hidden_size=32, intermediate_size=64
    batch, seq, hidden, intermediate = 2, 8, 32, 64

    key = jax.random.PRNGKey(0)
    k_x, k_w, k_b = jax.random.split(key, 3)

    x = jax.random.normal(k_x, (batch, seq, hidden), dtype=jnp.float32)
    # nn.Linear(hidden, intermediate): torch weight is [I, H]; we store it
    # transposed as [H, I] so the kernel does x @ w directly.
    w = jax.random.normal(k_w, (hidden, intermediate), dtype=jnp.float32) * 0.02
    b = jax.random.normal(k_b, (intermediate,), dtype=jnp.float32) * 0.02

    y = bert_intermediate(x, w, b)
    jax.block_until_ready(y)

    # Reference in plain JAX (same exact-gelu semantics as HF 'gelu').
    ref = x.reshape(-1, hidden) @ w + b
    ref = 0.5 * ref * (1.0 + jax.lax.erf(ref / jnp.sqrt(2.0)))
    ref = ref.reshape(batch, seq, intermediate)
    assert jnp.allclose(y, ref, atol=1e-5, rtol=1e-5), "mismatch vs reference"

    print("KERNEL_OK")
</pallas_src>

<mosaic_0001>
module attributes {stable_mosaic.version = 11 : i64} {
  func.func @_bert_intermediate_kernel(%arg0: i32, %arg1: i32, %arg2: memref<16x32xf32, #tpu.memory_space<vmem>>, %arg3: memref<32x64xf32, #tpu.memory_space<vmem>>, %arg4: memref<1x64xf32, #tpu.memory_space<vmem>>, %arg5: memref<16x64xf32, #tpu.memory_space<vmem>>) attributes {dimension_semantics = [#tpu.dimension_semantics<parallel>, #tpu.dimension_semantics<parallel>], iteration_bounds = array<i64: 1, 1>, scalar_prefetch = 0 : i64, scratch_operands = 0 : i64, tpu.core_type = #tpu.core_type<tc>, window_params = [{transform_indices = @transform_0, window_bounds = array<i64: 16, 32>}, {pipeline_mode = #tpu.pipeline_mode<synchronous>, transform_indices = @transform_1, window_bounds = array<i64: 32, 64>}, {pipeline_mode = #tpu.pipeline_mode<synchronous>, transform_indices = @transform_2, window_bounds = array<i64: 1, 64>}, {transform_indices = @transform_3, window_bounds = array<i64: 16, 64>}]} {
    %c0 = arith.constant 0 : index
    %c0_0 = arith.constant 0 : index
    %0 = vector.load %arg2[%c0, %c0_0] : memref<16x32xf32, #tpu.memory_space<vmem>>, vector<16x32xf32>
    %c0_1 = arith.constant 0 : index
    %c0_2 = arith.constant 0 : index
    %1 = vector.load %arg3[%c0_1, %c0_2] : memref<32x64xf32, #tpu.memory_space<vmem>>, vector<32x64xf32>
    %cst = arith.constant dense<0.000000e+00> : vector<16x64xf32>
    %2 = tpu.matmul %0, %1, %cst {dimension_numbers = #tpu.dot_dimension_numbers<[1], [0], [0], [1], [0, 0, 1, 1], [], []>} : vector<16x32xf32>, vector<32x64xf32>, vector<16x64xf32> -> vector<16x64xf32>
    %c0_3 = arith.constant 0 : index
    %c0_4 = arith.constant 0 : index
    %3 = vector.load %arg4[%c0_3, %c0_4] : memref<1x64xf32, #tpu.memory_space<vmem>>, vector<1x64xf32>
    %4 = vector.broadcast %3 : vector<1x64xf32> to vector<16x64xf32>
    %5 = arith.addf %2, %4 : vector<16x64xf32>
    %cst_5 = arith.constant 5.000000e-01 : f32
    %6 = vector.broadcast %cst_5 : f32 to vector<16x64xf32>
    %7 = arith.mulf %6, %5 : vector<16x64xf32>
    %cst_6 = arith.constant 0.707106769 : f32
    %8 = vector.broadcast %cst_6 : f32 to vector<16x64xf32>
    %9 = arith.mulf %5, %8 : vector<16x64xf32>
    %10 = math.erf %9 : vector<16x64xf32>
    %cst_7 = arith.constant 1.000000e+00 : f32
    %11 = vector.broadcast %cst_7 : f32 to vector<16x64xf32>
    %12 = arith.addf %11, %10 : vector<16x64xf32>
    %13 = arith.mulf %7, %12 : vector<16x64xf32>
    %c0_8 = arith.constant 0 : index
    %c0_9 = arith.constant 0 : index
    %14 = vector.load %arg5[%c0_8, %c0_9] : memref<16x64xf32, #tpu.memory_space<vmem>>, vector<16x64xf32>
    tpu.vector_store %arg5[%c0_8, %c0_9], %13 {strides = array<i32>} : memref<16x64xf32, #tpu.memory_space<vmem>>, vector<16x64xf32>,
    return
  }
  func.func @transform_0(%arg0: i32, %arg1: i32) -> (i32, i32) {
    %c0_i32 = arith.constant 0 : i32
    %c0_i32_0 = arith.constant 0 : i32
    return %arg1, %c0_i32 : i32, i32
  }
  func.func @transform_1(%arg0: i32, %arg1: i32) -> (i32, i32) {
    %c0_i32 = arith.constant 0 : i32
    %c0_i32_0 = arith.constant 0 : i32
    return %c0_i32, %arg0 : i32, i32
  }
  func.func @transform_2(%arg0: i32, %arg1: i32) -> (i32, i32) {
    %c0_i32 = arith.constant 0 : i32
    %c0_i32_0 = arith.constant 0 : i32
    return %c0_i32, %arg0 : i32, i32
  }
  func.func @transform_3(%arg0: i32, %arg1: i32) -> (i32, i32) {
    %c0_i32 = arith.constant 0 : i32
    return %arg1, %arg0 : i32, i32
  }
}

module attributes {stable_mosaic.version = 11 : i64} {
  func.func @_bert_intermediate_kernel(%arg0: i32, %arg1: i32, %arg2: memref<16x32xf32, #tpu.memory_space<vmem>>, %arg3: memref<32x64xf32, #tpu.memory_space<vmem>>, %arg4: memref<1x64xf32, #tpu.memory_space<vmem>>, %arg5: memref<16x64xf32, #tpu.memory_space<vmem>>) attributes {dimension_semantics = [#tpu.dimension_semantics<parallel>, #tpu.dimension_semantics<parallel>], iteration_bounds = array<i64: 1, 1>, scalar_prefetch = 0 : i64, scratch_operands = 0 : i64, tpu.core_type = #tpu.core_type<tc>, window_params = [{transform_indices = @transform_0, window_bounds = array<i64: 16, 32>}, {transform_indices = @transform_1, window_bounds = array<i64: 32, 64>}, {transform_indices = @transform_2, window_bounds = array<i64: 1, 64>}, {transform_indices = @transform_3, window_bounds = array<i64: 16, 64>}]} {
    %c0 = arith.constant 0 : index
    %c0_0 = arith.constant 0 : index
    %0 = vector.load %arg2[%c0, %c0_0] : memref<16x32xf32, #tpu.memory_space<vmem>>, vector<16x32xf32>
    %c0_1 = arith.constant 0 : index
    %c0_2 = arith.constant 0 : index
    %1 = vector.load %arg3[%c0_1, %c0_2] : memref<32x64xf32, #tpu.memory_space<vmem>>, vector<32x64xf32>
    %cst = arith.constant dense<0.000000e+00> : vector<16x64xf32>
    %2 = tpu.matmul %0, %1, %cst {dimension_numbers = #tpu.dot_dimension_numbers<[1], [0], [0], [1], [0, 0, 1, 1], [], []>} : vector<16x32xf32>, vector<32x64xf32>, vector<16x64xf32> -> vector<16x64xf32>
    %c0_3 = arith.constant 0 : index
    %c0_4 = arith.constant 0 : index
    %3 = vector.load %arg4[%c0_3, %c0_4] : memref<1x64xf32, #tpu.memory_space<vmem>>, vector<1x64xf32>
    %4 = vector.broadcast %3 : vector<1x64xf32> to vector<16x64xf32>
    %5 = arith.addf %2, %4 : vector<16x64xf32>
    %cst_5 = arith.constant 5.000000e-01 : f32
    %6 = vector.broadcast %cst_5 : f32 to vector<16x64xf32>
    %7 = arith.mulf %6, %5 : vector<16x64xf32>
    %cst_6 = arith.constant 0.707106769 : f32
    %8 = vector.broadcast %cst_6 : f32 to vector<16x64xf32>
    %9 = arith.mulf %5, %8 : vector<16x64xf32>
    %10 = math.erf %9 : vector<16x64xf32>
    %cst_7 = arith.constant 1.000000e+00 : f32
    %11 = vector.broadcast %cst_7 : f32 to vector<16x64xf32>
    %12 = arith.addf %11, %10 : vector<16x64xf32>
    %13 = arith.mulf %7, %12 : vector<16x64xf32>
    %c0_8 = arith.constant 0 : index
    %c0_9 = arith.constant 0 : index
    %14 = vector.load %arg5[%c0_8, %c0_9] : memref<16x64xf32, #tpu.memory_space<vmem>>, vector<16x64xf32>
    tpu.vector_store %arg5[%c0_8, %c0_9], %13 {strides = array<i32>} : memref<16x64xf32, #tpu.memory_space<vmem>>, vector<16x64xf32>,
    return
  }
  func.func @transform_0(%arg0: i32, %arg1: i32) -> (i32, i32) {
    %c0_i32 = arith.constant 0 : i32
    %c0_i32_0 = arith.constant 0 : i32
    return %arg1, %c0_i32 : i32, i32
  }
  func.func @transform_1(%arg0: i32, %arg1: i32) -> (i32, i32) {
    %c0_i32 = arith.constant 0 : i32
    %c0_i32_0 = arith.constant 0 : i32
    return %c0_i32, %arg0 : i32, i32
  }
  func.func @transform_2(%arg0: i32, %arg1: i32) -> (i32, i32) {
    %c0_i32 = arith.constant 0 : i32
    %c0_i32_0 = arith.constant 0 : i32
    return %c0_i32, %arg0 : i32, i32
  }
  func.func @transform_3(%arg0: i32, %arg1: i32) -> (i32, i32) {
    %c0_i32 = arith.constant 0 : i32
    return %arg1, %arg0 : i32, i32
  }
}

</mosaic_0001>

<bundles_post_ra>
// kernel: tpu_custom_call.1
= control target key start
LH: loop header
LB: loop body
LE: loop exit
PB: predicated region body
PF: predicated region fallthrough
CT: control target
= control target key end

     0   :  { %8 = vsyncpa [#allocation3], 0  ;;  %s351_s0 = inlined_call_operand.hbm [shape: f32[16,32], index: 0, kind: input, shape index: {}]   ;;  %s352_s1 = inlined_call_operand.hbm [shape: f32[32,64], index: 1, kind: input, shape index: {}]   ;;  %s353_s2 = inlined_call_operand.vmem [shape: f32[1,64], index: 2, kind: input, shape index: {}]   ;;  %s354_s3 = inlined_call_operand.hbm [shape: f32[16,64], index: 3, kind: output, shape index: {}]  }
   0x1   :  { %9 = vsyncpa [#allocation6], 0 }
   0x2   :  { %10 = vsyncpa [#allocation4], 0  ;;  %s278_s12 = smov [#allocation2]   ;;  %s206_s16 = scalar_lea.hbm %s351_s0, 256 }
   0x3   :  { %s16_s13 = sshll.u32 %s278_s12, 4  ;;  %p207_p0 = scmp.ne.s32.totalorder %s351_s0, %s206_s16  ;;  %s17_s13 = int_to_ptr.vmem [resolvable:$true] %s16_s13 }
   0x4   :  { %p210_p1 = scmp.lt.u32.totalorder %s206_s16, %s351_s0 }
   0x6   :  { %p212_p2 = pnand %p210_p1, %p207_p0 }
   0x8   :  { %215 = shalt.err (!%p212_p2)
}
   0x9   :  { %s216_s21 = scalar_lea.vmem %s17_s13, 256  ;;  %p221_p4 = scmp.lt.s32.totalorder %s17_s13, %s17_s13 }
   0xa   :  { %p217_p3 = scmp.ne.s32.totalorder %s17_s13, %s216_s21  ;;  %p222_p5 = scmp.lt.s32.totalorder %s216_s21, %s216_s21 }
   0xc   :  { %p223_p6 = por %p222_p5, %p221_p4 }
   0xe   :  { %p224_p7 = pnand %p223_p6, %p217_p3 }
  0x10   :  { %227 = shalt.err (!%p224_p7)
}
  0x11   :  { %s279_s22 = smov 128   ;;  %s280_s23 = smov 8  }
  0x12   :  { %22 = dma.hbm_to_vmem [thread:$0]  %s351_s0, 256, %s17_s13, [#allocation3], %s279_s22, %s279_s22, %s280_s23  }
  0x13   :  { %s281_s26 = smov [#allocation5]   ;;  %s228_s30 = scalar_lea.hbm %s352_s1, 512 }
  0x14   :  { %s28_s27 = sshll.u32 %s281_s26, 4  ;;  %p229_p8 = scmp.ne.s32.totalorder %s352_s1, %s228_s30  ;;  %s29_s27 = int_to_ptr.vmem [resolvable:$true] %s28_s27 }
  0x15   :  { %p232_p9 = scmp.lt.u32.totalorder %s228_s30, %s352_s1 }
  0x17   :  { %p234_p10 = pnand %p232_p9, %p229_p8 }
  0x19   :  { %237 = shalt.err (!%p234_p10)
}
  0x1a   :  { %s238_s8 = scalar_lea.vmem %s29_s27, 512  ;;  %p243_p12 = scmp.lt.s32.totalorder %s29_s27, %s29_s27 }
  0x1b   :  { %p239_p11 = scmp.ne.s32.totalorder %s29_s27, %s238_s8  ;;  %p244_p13 = scmp.lt.s32.totalorder %s238_s8, %s238_s8 }
  0x1d   :  { %p245_p0 = por %p244_p13, %p243_p12 }
  0x1f   :  { %p246_p1 = pnand %p245_p0, %p239_p11 }
  0x21   :  { %249 = shalt.err (!%p246_p1)
}
  0x22   :  { %34 = dma.hbm_to_vmem [thread:$0]  %s352_s1, 512, %s29_s27, [#allocation6], %s279_s22, %s279_s22, %s280_s23  }
  0x23   :  { %272 = dma.done.wait [#allocation3], 256  }
  0x24   :  { %273 = vsyncadd [#allocation3], 4294967040 }
  0x25   :  { %274 = dma.done.wait [#allocation6], 512  }
  0x26   :  { %275 = vsyncadd [#allocation6], 4294966784  ;;  %vm56_vm0 = vcmask 261120   ;;  %v45_v0 = vld [vmem:[#allocation5] sm:$0xff]  ;;  %v46_v1 = vld [vmem:[#allocation5 + $0x8] sm:$0xff]  ;;  %s282_s11 = smov [#allocation7]  }
  0x27   :  { %v47_v2 = vld [vmem:[#allocation5 + $0x10] sm:$0xff]  ;;  %v189_v3 = vpack.c.bf16 %v46_v1, %v45_v0  ;;  %v48_v4 = vld [vmem:[#allocation5 + $0x18] sm:$0xff]  ;;  %s156_s12 = sshll.u32 %s282_s11, 4  ;;  %vm148_vm1 = vcmask 523264   ;;  %s157_s12 = int_to_ptr.vmem [resolvable:$true] %s156_s12 }
  0x28   :  { %v43_v5 = vld [vmem:[#allocation2] sm:$0xff]  ;;  %v193_v6 = vpack.c.bf16 %v48_v4, %v47_v2  ;;  %v44_v7 = vld [vmem:[#allocation2 + $0x8] sm:$0xff]  ;;  %p255_p3 = scmp.lt.s32.totalorder %s157_s12, %s157_s12 }
  0x29   :  { %186 = vmatprep.mubr.msk.f32.mxu0 %vm56_vm0, %v43_v5  ;;  %190 = vmatprep.subr.bf16.mxu0 %v189_v3  ;;  %v169_v8 = vld [vmem:[%s353_s2] ss:$0 sm:$0xff]  ;;  %s250_s2 = scalar_lea.vmem %s157_s12, 256 }
  0x2a   :  { %192 = vmatpush3.bf16.msra.mxu0 %v189_v3  ;;  %p251_p2 = scmp.ne.s32.totalorder %s157_s12, %s250_s2  ;;  %p256_p4 = scmp.lt.s32.totalorder %s250_s2, %s250_s2 }
  0x2b   :  { %194 = vmatprep.subr.bf16.mxu0 %v193_v6 }
  0x2c   :  { %p257_p5 = por %p256_p4, %p255_p3 }
  0x2e   :  { %196 = vmatpush3.bf16.msra.mxu0 %v193_v6  ;;  %p258_p6 = pnand %p257_p5, %p251_p2 }
  0x31   :  { %187 = vmatmul.mubr.msk.f32.vlgmr.msra.gmra.mrb[0].mxu0 %vm56_vm0, %v44_v7 }
 0x104   :  { %v188_v9 = vpop.f32.mrb[0].mxu0 }
 0x105   :  { %v135_v10 = vadd.f32 %v188_v9, %v169_v8  ;;  %v129_v11 = vpop.f32.mrb[1].mxu0 }
 0x106   :  { %v130_v12 = vadd.f32 %v169_v8, %v129_v11 }
 0x107   :  { %v141_v13 = vmul.f32 0.70710677, %v135_v10  ;;  %v139_v17 = vmul.f32 0.5, %v135_v10 }
 0x108   :  { %v140_v14 = vmul.f32 0.70710677, %v130_v12  ;;  %v138_v19 = vmul.f32 0.5, %v130_v12 }
 0x109   :  { %202 = verf.f32 %v141_v13 }
 0x10a   :  { %204 = verf.f32 %v140_v14 }
 0x113   :  { %v203_v15 = vpop.eup %202 }
 0x114   :  { %v205_v16 = vpop.eup %204  ;;  %v145_v18 = vadd.f32 1.0, %v203_v15 }
 0x115   :  { %v144_v20 = vadd.f32 1.0, %v205_v16 }
 0x116   :  { %v147_v21 = vmul.f32 %v145_v18, %v139_v17 }
 0x117   :  { %v146_v22 = vmul.f32 %v144_v20, %v138_v19 }
 0x118   :  { %150 = vst.msk [vmem:[#allocation7 + $0x8] sm:$0xff] %vm148_vm1, %v147_v21 }
 0x119   :  { %149 = vst.msk [vmem:[#allocation7] sm:$0xff] %vm148_vm1, %v146_v22 }
 0x11a   :  { %261 = shalt.err (!%p258_p6)
}
 0x11b   :  { %s262_s15 = scalar_lea.hbm %s354_s3, 256 }
 0x11c   :  { %p263_p7 = scmp.ne.s32.totalorder %s354_s3, %s262_s15  ;;  %p266_p8 = scmp.lt.u32.totalorder %s262_s15, %s354_s3 }
 0x11e   :  { %p268_p9 = pnand %p266_p8, %p263_p7 }
 0x120   :  { %271 = shalt.err (!%p268_p9)
}
 0x121   :  { %162 = dma.vmem_to_hbm [thread:$0]  %s157_s12, 256, %s354_s3, [#allocation4], %s279_s22, %s279_s22, %s280_s23  }
 0x122   :  { %276 = dma.done.wait [#allocation4], 256  }
 0x123   :  { %277 = vsyncadd [#allocation4], 4294967040 }
 0x124   :  { %166 = vsyncpa [#allocation3], 1 }
 0x125   :  { %167 = vsyncpa [#allocation6], 1 }
 0x126   :  { %168 = vsyncpa [#allocation4], 1 }

// kernel: tpu_custom_call.1
= control target key start
LH: loop header
LB: loop body
LE: loop exit
PB: predicated region body
PF: predicated region fallthrough
CT: control target
= control target key end

     0   :  { %8 = vsyncpa [#allocation3], 0  ;;  %s351_s0 = inlined_call_operand.hbm [shape: f32[16,32], index: 0, kind: input, shape index: {}]   ;;  %s352_s1 = inlined_call_operand.hbm [shape: f32[32,64], index: 1, kind: input, shape index: {}]   ;;  %s353_s2 = inlined_call_operand.vmem [shape: f32[1,64], index: 2, kind: input, shape index: {}]   ;;  %s354_s3 = inlined_call_operand.hbm [shape: f32[16,64], index: 3, kind: output, shape index: {}]  }
   0x1   :  { %9 = vsyncpa [#allocation6], 0 }
   0x2   :  { %10 = vsyncpa [#allocation4], 0  ;;  %s278_s12 = smov [#allocation2]   ;;  %s206_s16 = scalar_lea.hbm %s351_s0, 256 }
   0x3   :  { %s16_s13 = sshll.u32 %s278_s12, 4  ;;  %p207_p0 = scmp.ne.s32.totalorder %s351_s0, %s206_s16  ;;  %s17_s13 = int_to_ptr.vmem [resolvable:$true] %s16_s13 }
   0x4   :  { %p210_p1 = scmp.lt.u32.totalorder %s206_s16, %s351_s0 }
   0x6   :  { %p212_p2 = pnand %p210_p1, %p207_p0 }
   0x8   :  { %215 = shalt.err (!%p212_p2)
}
   0x9   :  { %s216_s21 = scalar_lea.vmem %s17_s13, 256  ;;  %p221_p4 = scmp.lt.s32.totalorder %s17_s13, %s17_s13 }
   0xa   :  { %p217_p3 = scmp.ne.s32.totalorder %s17_s13, %s216_s21  ;;  %p222_p5 = scmp.lt.s32.totalorder %s216_s21, %s216_s21 }
   0xc   :  { %p223_p6 = por %p222_p5, %p221_p4 }
   0xe   :  { %p224_p7 = pnand %p223_p6, %p217_p3 }
  0x10   :  { %227 = shalt.err (!%p224_p7)
}
  0x11   :  { %s279_s22 = smov 128   ;;  %s280_s23 = smov 8  }
  0x12   :  { %22 = dma.hbm_to_vmem [thread:$0]  %s351_s0, 256, %s17_s13, [#allocation3], %s279_s22, %s279_s22, %s280_s23  }
  0x13   :  { %s281_s26 = smov [#allocation5]   ;;  %s228_s30 = scalar_lea.hbm %s352_s1, 512 }
  0x14   :  { %s28_s27 = sshll.u32 %s281_s26, 4  ;;  %p229_p8 = scmp.ne.s32.totalorder %s352_s1, %s228_s30  ;;  %s29_s27 = int_to_ptr.vmem [resolvable:$true] %s28_s27 }
  0x15   :  { %p232_p9 = scmp.lt.u32.totalorder %s228_s30, %s352_s1 }
  0x17   :  { %p234_p10 = pnand %p232_p9, %p229_p8 }
  0x19   :  { %237 = shalt.err (!%p234_p10)
}
  0x1a   :  { %s238_s8 = scalar_lea.vmem %s29_s27, 512  ;;  %p243_p12 = scmp.lt.s32.totalorder %s29_s27, %s29_s27 }
  0x1b   :  { %p239_p11 = scmp.ne.s32.totalorder %s29_s27, %s238_s8  ;;  %p244_p13 = scmp.lt.s32.totalorder %s238_s8, %s238_s8 }
  0x1d   :  { %p245_p0 = por %p244_p13, %p243_p12 }
  0x1f   :  { %p246_p1 = pnand %p245_p0, %p239_p11 }
  0x21   :  { %249 = shalt.err (!%p246_p1)
}
  0x22   :  { %34 = dma.hbm_to_vmem [thread:$0]  %s352_s1, 512, %s29_s27, [#allocation6], %s279_s22, %s279_s22, %s280_s23  }
  0x23   :  { %272 = dma.done.wait [#allocation3], 256  }
  0x24   :  { %273 = vsyncadd [#allocation3], 4294967040 }
  0x25   :  { %274 = dma.done.wait [#allocation6], 512  }
  0x26   :  { %275 = vsyncadd [#allocation6], 4294966784  ;;  %vm56_vm0 = vcmask 261120   ;;  %v45_v0 = vld [vmem:[#allocation5] sm:$0xff]  ;;  %v46_v1 = vld [vmem:[#allocation5 + $0x8] sm:$0xff]  ;;  %s282_s11 = smov [#allocation7]  }
  0x27   :  { %v47_v2 = vld [vmem:[#allocation5 + $0x10] sm:$0xff]  ;;  %v189_v3 = vpack.c.bf16 %v46_v1, %v45_v0  ;;  %v48_v4 = vld [vmem:[#allocation5 + $0x18] sm:$0xff]  ;;  %s156_s12 = sshll.u32 %s282_s11, 4  ;;  %vm148_vm1 = vcmask 523264   ;;  %s157_s12 = int_to_ptr.vmem [resolvable:$true] %s156_s12 }
  0x28   :  { %v43_v5 = vld [vmem:[#allocation2] sm:$0xff]  ;;  %v193_v6 = vpack.c.bf16 %v48_v4, %v47_v2  ;;  %v44_v7 = vld [vmem:[#allocation2 + $0x8] sm:$0xff]  ;;  %p255_p3 = scmp.lt.s32.totalorder %s157_s12, %s157_s12 }
  0x29   :  { %186 = vmatprep.mubr.msk.f32.mxu0 %vm56_vm0, %v43_v5  ;;  %190 = vmatprep.subr.bf16.mxu0 %v189_v3  ;;  %v169_v8 = vld [vmem:[%s353_s2] ss:$0 sm:$0xff]  ;;  %s250_s2 = scalar_lea.vmem %s157_s12, 256 }
  0x2a   :  { %192 = vmatpush3.bf16.msra.mxu0 %v189_v3  ;;  %p251_p2 = scmp.ne.s32.totalorder %s157_s12, %s250_s2  ;;  %p256_p4 = scmp.lt.s32.totalorder %s250_s2, %s250_s2 }
  0x2b   :  { %194 = vmatprep.subr.bf16.mxu0 %v193_v6 }
  0x2c   :  { %p257_p5 = por %p256_p4, %p255_p3 }
  0x2e   :  { %196 = vmatpush3.bf16.msra.mxu0 %v193_v6  ;;  %p258_p6 = pnand %p257_p5, %p251_p2 }
  0x31   :  { %187 = vmatmul.mubr.msk.f32.vlgmr.msra.gmra.mrb[0].mxu0 %vm56_vm0, %v44_v7 }
 0x104   :  { %v188_v9 = vpop.f32.mrb[0].mxu0 }
 0x105   :  { %v135_v10 = vadd.f32 %v188_v9, %v169_v8  ;;  %v129_v11 = vpop.f32.mrb[1].mxu0 }
 0x106   :  { %v130_v12 = vadd.f32 %v169_v8, %v129_v11 }
 0x107   :  { %v141_v13 = vmul.f32 0.70710677, %v135_v10  ;;  %v139_v17 = vmul.f32 0.5, %v135_v10 }
 0x108   :  { %v140_v14 = vmul.f32 0.70710677, %v130_v12  ;;  %v138_v19 = vmul.f32 0.5, %v130_v12 }
 0x109   :  { %202 = verf.f32 %v141_v13 }
 0x10a   :  { %204 = verf.f32 %v140_v14 }
 0x113   :  { %v203_v15 = vpop.eup %202 }
 0x114   :  { %v205_v16 = vpop.eup %204  ;;  %v145_v18 = vadd.f32 1.0, %v203_v15 }
 0x115   :  { %v144_v20 = vadd.f32 1.0, %v205_v16 }
 0x116   :  { %v147_v21 = vmul.f32 %v145_v18, %v139_v17 }
 0x117   :  { %v146_v22 = vmul.f32 %v144_v20, %v138_v19 }
 0x118   :  { %150 = vst.msk [vmem:[#allocation7 + $0x8] sm:$0xff] %vm148_vm1, %v147_v21 }
 0x119   :  { %149 = vst.msk [vmem:[#allocation7] sm:$0xff] %vm148_vm1, %v146_v22 }
 0x11a   :  { %261 = shalt.err (!%p258_p6)
}
 0x11b   :  { %s262_s15 = scalar_lea.hbm %s354_s3, 256 }
 0x11c   :  { %p263_p7 = scmp.ne.s32.totalorder %s354_s3, %s262_s15  ;;  %p266_p8 = scmp.lt.u32.totalorder %s262_s15, %s354_s3 }
 0x11e   :  { %p268_p9 = pnand %p266_p8, %p263_p7 }
 0x120   :  { %271 = shalt.err (!%p268_p9)
}
 0x121   :  { %162 = dma.vmem_to_hbm [thread:$0]  %s157_s12, 256, %s354_s3, [#allocation4], %s279_s22, %s279_s22, %s280_s23  }
 0x122   :  { %276 = dma.done.wait [#allocation4], 256  }
 0x123   :  { %277 = vsyncadd [#allocation4], 4294967040 }
 0x124   :  { %166 = vsyncpa [#allocation3], 1 }
 0x125   :  { %167 = vsyncpa [#allocation6], 1 }
 0x126   :  { %168 = vsyncpa [#allocation4], 1 }

</bundles_post_ra>
